<compile_context>
chip_gen: v6e
topology: v6e:2x2x1
jax: 0.10.0
libtpu: 0.0.40
codegen_flags: <defaults>
</compile_context>

<pallas_src>
import math

import jax
import jax.numpy as jnp
from jax.experimental import pallas as pl
from jax.experimental.pallas import tpu as pltpu

_LANE = 128      # vreg lane width   (last dim)
_SUBLANE = 8     # vreg sublane width (second-to-last dim)


def _round_up(n, m):
    return ((n + m - 1) // m) * m


def _pad_axis(a, axis, target):
    pad = target - a.shape[axis]
    if pad == 0:
        return a
    widths = [(0, 0)] * a.ndim
    widths[axis] = (0, pad)
    return jnp.pad(a, widths)


# ----------------------------- kernels -----------------------------

def _fusion_proj_kernel(x0_ref, w_ref, bias_ref, out_ref):
    """inp_x != out branch with BN/skip folded:  out = ReLU( x0 @ Wc + bias_row )."""
    acc = jnp.dot(x0_ref[...], w_ref[...], preferred_element_type=jnp.float32)
    out_ref[...] = jnp.maximum(acc + bias_ref[...], 0.0)


def _fusion_id_kernel(x0_ref, w_ref, bias_ref, out_ref):
    """inp_x == out branch:  out = ReLU( x0 + x0 @ W1x + lang_row )."""
    x0 = x0_ref[...]
    acc = jnp.dot(x0, w_ref[...], preferred_element_type=jnp.float32)
    out_ref[...] = jnp.maximum(x0 + acc + bias_ref[...], 0.0)


# ----------------------------- wrapper -----------------------------

def pt_language_fusion_block(x0, lang, w1, w2=None, bn2=None, eps=1e-5, tile_b=512):
    """Forward pass of PTLanguageFusionBlock.

    x0   : [B, inp_x] float32
    lang : [inp_lang] float32
    w1   : [out, inp_x + inp_lang]   (torch Linear layout, bias=False)
    w2   : [out, inp_x] or None      (torch Linear layout, bias=False)
    bn2  : (gamma, beta, running_mean, running_var), each [out]  (required if w2 given)
    """
    B, c_x = x0.shape
    lang = lang.reshape(-1)
    c_lang = lang.shape[0]
    c_out, c_in = w1.shape
    assert c_in == c_x + c_lang
    has_proj = w2 is not None
    if not has_proj:
        assert c_x == c_out, "identity skip requires inp_x == out"

    # Split W1 into the x0 part and the language part; transpose to [in, out].
    w1x = jnp.transpose(w1[:, :c_x])                                   # [c_x, c_out]
    w1l = jnp.transpose(w1[:, c_x:])                                   # [c_lang, c_out]
    # Loop-invariant language projection, computed once (not per grid step).
    lang_row = jnp.dot(lang.reshape(1, c_lang), w1l,
                       precision=jax.lax.Precision.HIGHEST)            # [1, c_out]

    if has_proj:
        gamma, beta, r_mean, r_var = bn2
        scale = gamma * jax.lax.rsqrt(r_var + eps)       # eval-mode BN folded
        shift = beta - r_mean * scale
        # Fold the BN-scaled skip weight into the main weight -> single in-kernel matmul.
        w_comb = w1x + jnp.transpose(w2) * scale.reshape(1, c_out)     # [c_x, c_out]
        bias_row = lang_row + shift.reshape(1, c_out)                  # [1, c_out]
        kernel = _fusion_proj_kernel
    else:
        w_comb = w1x
        bias_row = lang_row
        kernel = _fusion_id_kernel

    # Lane/sublane-friendly padding.
    cx_p = _round_up(c_x, _LANE)
    co_p = _round_up(c_out, _LANE)
    tile_b = min(tile_b, _round_up(B, _SUBLANE))
    b_p = _round_up(B, tile_b)

    x0_p = _pad_axis(_pad_axis(x0, 1, cx_p), 0, b_p)
    w_p = _pad_axis(_pad_axis(w_comb, 0, cx_p), 1, co_p)
    bias_p = _pad_axis(bias_row, 1, co_p)

    grid = (b_p // tile_b,)
    row_spec = pl.BlockSpec((tile_b, cx_p), lambda i: (i, 0))
    out_spec = pl.BlockSpec((tile_b, co_p), lambda i: (i, 0))
    full = lambda shape: pl.BlockSpec(shape, lambda i: (0, 0))         # resident operands

    # Rough VMEM budget: double-buffered row/out tiles + resident weight/bias (+ margin).
    vmem_bytes = 4 * (2 * 2 * tile_b * (cx_p + co_p)
                      + 2 * cx_p * co_p + 2 * co_p) + (2 << 20)
    cparams = pltpu.CompilerParams(
        dimension_semantics=("parallel",),
        vmem_limit_bytes=int(min(max(vmem_bytes, 4 << 20), 64 << 20)))

    out_p = pl.pallas_call(
        kernel,
        grid=grid,
        out_shape=jax.ShapeDtypeStruct((b_p, co_p), jnp.float32),
        in_specs=[row_spec,
                  full((cx_p, co_p)),
                  full((1, co_p))],
        out_specs=out_spec,
        compiler_params=cparams,
    )(x0_p, w_p, bias_p)

    return out_p[:B, :c_out]


# ----------------------------- reference -----------------------------

def reference(x0, lang, w1, w2=None, bn2=None, eps=1e-5):
    """Pure-JAX mirror of the PyTorch forward (BatchNorm1d in eval mode)."""
    B = x0.shape[0]
    lang2 = lang.reshape(1, -1)
    x = jnp.concatenate([x0, jnp.tile(lang2, (B, 1))], axis=1)
    x = jnp.dot(x, w1.T, precision=jax.lax.Precision.HIGHEST)
    if w2 is not None:
        gamma, beta, r_mean, r_var = bn2
        y = jnp.dot(x0, w2.T, precision=jax.lax.Precision.HIGHEST)
        x0 = (y - r_mean) / jnp.sqrt(r_var + eps) * gamma + beta
    return jax.nn.relu(x0 + x)


if __name__ == "__main__":
    key = jax.random.PRNGKey(0)
    ks = jax.random.split(key, 12)

    # ---- Config A: inp_x != out  (Linear2 + BatchNorm1d skip branch) ----
    B, inp_x, inp_lang, c_out = 16, 32, 32, 64
    x0 = jax.random.normal(ks[0], (B, inp_x), jnp.float32)
    lang = jax.random.normal(ks[1], (inp_lang,), jnp.float32)
    w1 = jax.random.normal(ks[2], (c_out, inp_x + inp_lang), jnp.float32) \
        * (1.0 / math.sqrt(inp_x + inp_lang))
    w2 = jax.random.normal(ks[3], (c_out, inp_x), jnp.float32) * (1.0 / math.sqrt(inp_x))
    gamma = 1.0 + 0.1 * jax.random.normal(ks[4], (c_out,), jnp.float32)
    beta = 0.1 * jax.random.normal(ks[5], (c_out,), jnp.float32)
    r_mean = 0.1 * jax.random.normal(ks[6], (c_out,), jnp.float32)
    r_var = jnp.abs(1.0 + 0.1 * jax.random.normal(ks[7], (c_out,), jnp.float32))
    bn2 = (gamma, beta, r_mean, r_var)

    out_a = pt_language_fusion_block(x0, lang, w1, w2=w2, bn2=bn2)
    out_a = jax.block_until_ready(out_a)
    ref_a = reference(x0, lang, w1, w2=w2, bn2=bn2)
    assert out_a.shape == (B, c_out)
    assert jnp.allclose(out_a, ref_a, rtol=2e-3, atol=2e-3), \
        f"proj branch max err {jnp.max(jnp.abs(out_a - ref_a))}"

    # ---- Config B: inp_x == out  (identity skip branch) ----
    inp_x_b = c_out
    x0_b = jax.random.normal(ks[8], (B, inp_x_b), jnp.float32)
    lang_b = jax.random.normal(ks[9], (inp_lang,), jnp.float32)
    w1_b = jax.random.normal(ks[10], (c_out, inp_x_b + inp_lang), jnp.float32) \
        * (1.0 / math.sqrt(inp_x_b + inp_lang))

    out_b = pt_language_fusion_block(x0_b, lang_b, w1_b)
    out_b = jax.block_until_ready(out_b)
    ref_b = reference(x0_b, lang_b, w1_b)
    assert out_b.shape == (B, c_out)
    assert jnp.allclose(out_b, ref_b, rtol=2e-3, atol=2e-3), \
        f"identity branch max err {jnp.max(jnp.abs(out_b - ref_b))}"

    print("KERNEL_OK")
</pallas_src>

<mosaic_0001>
module attributes {stable_mosaic.version = 11 : i64} {
  func.func @_fusion_proj_kernel(%arg0: i32, %arg1: memref<16x128xf32, #tpu.memory_space<vmem>>, %arg2: memref<128x128xf32, #tpu.memory_space<vmem>>, %arg3: memref<1x128xf32, #tpu.memory_space<vmem>>, %arg4: memref<16x128xf32, #tpu.memory_space<vmem>>) attributes {dimension_semantics = [#tpu.dimension_semantics<parallel>], iteration_bounds = array<i64: 1>, scalar_prefetch = 0 : i64, scratch_operands = 0 : i64, tpu.core_type = #tpu.core_type<tc>, window_params = [{transform_indices = @transform_0, window_bounds = array<i64: 16, 128>}, {pipeline_mode = #tpu.pipeline_mode<synchronous>, transform_indices = @transform_1, window_bounds = array<i64: 128, 128>}, {pipeline_mode = #tpu.pipeline_mode<synchronous>, transform_indices = @transform_2, window_bounds = array<i64: 1, 128>}, {transform_indices = @transform_3, window_bounds = array<i64: 16, 128>}]} {
    %c0 = arith.constant 0 : index
    %c0_0 = arith.constant 0 : index
    %0 = vector.load %arg1[%c0, %c0_0] : memref<16x128xf32, #tpu.memory_space<vmem>>, vector<16x128xf32>
    %c0_1 = arith.constant 0 : index
    %c0_2 = arith.constant 0 : index
    %1 = vector.load %arg2[%c0_1, %c0_2] : memref<128x128xf32, #tpu.memory_space<vmem>>, vector<128x128xf32>
    %cst = arith.constant dense<0.000000e+00> : vector<16x128xf32>
    %2 = tpu.matmul %0, %1, %cst {dimension_numbers = #tpu.dot_dimension_numbers<[1], [0], [0], [1], [0, 0, 1, 1], [], []>} : vector<16x128xf32>, vector<128x128xf32>, vector<16x128xf32> -> vector<16x128xf32>
    %c0_3 = arith.constant 0 : index
    %c0_4 = arith.constant 0 : index
    %3 = vector.load %arg3[%c0_3, %c0_4] : memref<1x128xf32, #tpu.memory_space<vmem>>, vector<1x128xf32>
    %4 = vector.broadcast %3 : vector<1x128xf32> to vector<16x128xf32>
    %5 = arith.addf %2, %4 : vector<16x128xf32>
    %cst_5 = arith.constant 0.000000e+00 : f32
    %6 = vector.broadcast %cst_5 : f32 to vector<16x128xf32>
    %7 = arith.maximumf %5, %6 : vector<16x128xf32>
    %c0_6 = arith.constant 0 : index
    %c0_7 = arith.constant 0 : index
    %8 = vector.load %arg4[%c0_6, %c0_7] : memref<16x128xf32, #tpu.memory_space<vmem>>, vector<16x128xf32>
    tpu.vector_store %arg4[%c0_6, %c0_7], %7 {strides = array<i32>} : memref<16x128xf32, #tpu.memory_space<vmem>>, vector<16x128xf32>,
    return
  }
  func.func @transform_0(%arg0: i32) -> (i32, i32) {
    %c0_i32 = arith.constant 0 : i32
    %c0_i32_0 = arith.constant 0 : i32
    return %arg0, %c0_i32 : i32, i32
  }
  func.func @transform_1(%arg0: i32) -> (i32, i32) {
    %c0_i32 = arith.constant 0 : i32
    %c0_i32_0 = arith.constant 0 : i32
    %c0_i32_1 = arith.constant 0 : i32
    return %c0_i32, %c0_i32_0 : i32, i32
  }
  func.func @transform_2(%arg0: i32) -> (i32, i32) {
    %c0_i32 = arith.constant 0 : i32
    %c0_i32_0 = arith.constant 0 : i32
    %c0_i32_1 = arith.constant 0 : i32
    return %c0_i32, %c0_i32_0 : i32, i32
  }
  func.func @transform_3(%arg0: i32) -> (i32, i32) {
    %c0_i32 = arith.constant 0 : i32
    %c0_i32_0 = arith.constant 0 : i32
    return %arg0, %c0_i32 : i32, i32
  }
}

</mosaic_0001>

<bundles_post_ra>
// kernel: tpu_custom_call.1
= control target key start
LH: loop header
LB: loop body
LE: loop exit
PB: predicated region body
PF: predicated region fallthrough
CT: control target
= control target key end

     0   :  { %8 = vsyncpa [#allocation3], 0  ;;  %s336_s0 = inlined_call_operand.hbm [shape: f32[16,128], index: 0, kind: input, shape index: {}]   ;;  %s337_s1 = inlined_call_operand.hbm [shape: f32[128,128], index: 1, kind: input, shape index: {}]   ;;  %s338_s2 = inlined_call_operand.vmem [shape: f32[1,128], index: 2, kind: input, shape index: {}]   ;;  %s339_s3 = inlined_call_operand.hbm [shape: f32[16,128], index: 3, kind: output, shape index: {}]  }
   0x1   :  { %9 = vsyncpa [#allocation6], 0 }
   0x2   :  { %10 = vsyncpa [#allocation4], 0  ;;  %s290_s12 = smov [#allocation2]  }
   0x3   :  { %s16_s13 = sshll.u32 %s290_s12, 4  ;;  %s17_s13 = int_to_ptr.vmem [resolvable:$true] %s16_s13 }
   0x4   :  { %s232_s14 = scalar_lea.vmem %s17_s13, 256  ;;  %p237_p1 = scmp.lt.s32.totalorder %s17_s13, %s17_s13 }
   0x5   :  { %p233_p0 = scmp.ne.s32.totalorder %s17_s13, %s232_s14  ;;  %p238_p2 = scmp.lt.s32.totalorder %s232_s14, %s232_s14 }
   0x7   :  { %p239_p3 = por %p238_p2, %p237_p1 }
   0x9   :  { %p240_p4 = pnand %p239_p3, %p233_p0 }
   0xb   :  { %243 = shalt.err (!%p240_p4)
}
   0xc   :  { %s291_s15 = smov 128   ;;  %s292_s16 = smov 8  }
   0xd   :  { %22 = dma.hbm_to_vmem [thread:$0]  %s336_s0, 256, %s17_s13, [#allocation3], %s291_s15, %s291_s15, %s292_s16  }
   0xe   :  { %s293_s19 = smov [#allocation5]  }
   0xf   :  { %s28_s20 = sshll.u32 %s293_s19, 4  ;;  %s29_s20 = int_to_ptr.vmem [resolvable:$true] %s28_s20 }
  0x10   :  { %s252_s21 = scalar_lea.vmem %s29_s20, 2048  ;;  %p257_p6 = scmp.lt.s32.totalorder %s29_s20, %s29_s20 }
  0x11   :  { %p253_p5 = scmp.ne.s32.totalorder %s29_s20, %s252_s21  ;;  %p258_p7 = scmp.lt.s32.totalorder %s252_s21, %s252_s21 }
  0x13   :  { %p259_p8 = por %p258_p7, %p257_p6 }
  0x15   :  { %p260_p9 = pnand %p259_p8, %p253_p5 }
  0x17   :  { %263 = shalt.err (!%p260_p9)
}
  0x18   :  { %34 = dma.hbm_to_vmem [thread:$0]  %s337_s1, 2048, %s29_s20, [#allocation6], %s291_s15, %s291_s15, %s292_s16  }
  0x19   :  { %284 = dma.done.wait [#allocation3], 256  }
  0x1a   :  { %285 = vsyncadd [#allocation3], 4294967040 }
  0x1b   :  { %286 = dma.done.wait [#allocation6], 2048  }
  0x1c   :  { %287 = vsyncadd [#allocation6], 4294965248  ;;  %v60_v0 = vld [vmem:[#allocation5 + $0x78] sm:$0xff]  ;;  %v59_v1 = vld [vmem:[#allocation5 + $0x70] sm:$0xff]  ;;  %s294_s24 = smov [#allocation7]  }
  0x1d   :  { %184 = vmatprep.subr.mxu0 %v60_v0  ;;  %v58_v2 = vld [vmem:[#allocation5 + $0x68] sm:$0xff]  ;;  %v57_v3 = vld [vmem:[#allocation5 + $0x60] sm:$0xff]  ;;  %v43_v4 = vld [vmem:[#allocation2] sm:$0xff]  ;;  %s152_s25 = sshll.u32 %s294_s24, 4  ;;  %s153_s25 = int_to_ptr.vmem [resolvable:$true] %s152_s25 }
  0x1e   :  { %185 = vmatpush3.msra.mxu0 %v60_v0  ;;  %v56_v5 = vld [vmem:[#allocation5 + $0x58] sm:$0xff]  ;;  %216 = vmatprep.mubr.f32.mxu0 %v43_v4  ;;  %v55_v6 = vld [vmem:[#allocation5 + $0x50] sm:$0xff]  ;;  %v54_v7 = vld [vmem:[#allocation5 + $0x48] sm:$0xff]  ;;  %s264_s26 = scalar_lea.vmem %s153_s25, 256  ;;  %p269_p11 = scmp.lt.s32.totalorder %s153_s25, %s153_s25 }
  0x1f   :  { %186 = vmatprep.subr.mxu0 %v59_v1  ;;  %v53_v8 = vld [vmem:[#allocation5 + $0x40] sm:$0xff]  ;;  %v52_v9 = vld [vmem:[#allocation5 + $0x38] sm:$0xff]  ;;  %v51_v10 = vld [vmem:[#allocation5 + $0x30] sm:$0xff]  ;;  %p265_p10 = scmp.ne.s32.totalorder %s153_s25, %s264_s26  ;;  %p270_p12 = scmp.lt.s32.totalorder %s264_s26, %s264_s26 }
  0x20   :  { %187 = vmatpush3.msra.mxu0 %v59_v1  ;;  %v50_v11 = vld [vmem:[#allocation5 + $0x28] sm:$0xff]  ;;  %v49_v12 = vld [vmem:[#allocation5 + $0x20] sm:$0xff]  ;;  %v48_v13 = vld [vmem:[#allocation5 + $0x18] sm:$0xff] }
  0x21   :  { %188 = vmatprep.subr.mxu0 %v58_v2  ;;  %v47_v14 = vld [vmem:[#allocation5 + $0x10] sm:$0xff]  ;;  %v46_v15 = vld [vmem:[#allocation5 + $0x8] sm:$0xff]  ;;  %v45_v16 = vld [vmem:[#allocation5] sm:$0xff]  ;;  %p271_p13 = por %p270_p12, %p269_p11 }
  0x22   :  { %189 = vmatpush3.msra.mxu0 %v58_v2  ;;  %v44_v17 = vld [vmem:[#allocation2 + $0x8] sm:$0xff]  ;;  %v165_v18 = vld [vmem:[%s338_s2] ss:$0 sm:$0xff] }
  0x23   :  { %190 = vmatprep.subr.mxu0 %v57_v3  ;;  %p272_p0 = pnand %p271_p13, %p265_p10 }
  0x24   :  { %191 = vmatpush3.msra.mxu0 %v57_v3 }
  0x25   :  { %192 = vmatprep.subr.mxu0 %v56_v5 }
  0x26   :  { %193 = vmatpush3.msra.mxu0 %v56_v5 }
  0x27   :  { %194 = vmatprep.subr.mxu0 %v55_v6 }
  0x28   :  { %195 = vmatpush3.msra.mxu0 %v55_v6 }
  0x29   :  { %196 = vmatprep.subr.mxu0 %v54_v7 }
  0x2a   :  { %197 = vmatpush3.msra.mxu0 %v54_v7 }
  0x2b   :  { %198 = vmatprep.subr.mxu0 %v53_v8 }
  0x2c   :  { %199 = vmatpush3.msra.mxu0 %v53_v8 }
  0x2d   :  { %200 = vmatprep.subr.mxu0 %v52_v9 }
  0x2e   :  { %201 = vmatpush3.msra.mxu0 %v52_v9 }
  0x2f   :  { %202 = vmatprep.subr.mxu0 %v51_v10 }
  0x30   :  { %203 = vmatpush3.msra.mxu0 %v51_v10 }
  0x31   :  { %204 = vmatprep.subr.mxu0 %v50_v11 }
  0x32   :  { %205 = vmatpush3.msra.mxu0 %v50_v11 }
  0x33   :  { %206 = vmatprep.subr.mxu0 %v49_v12 }
  0x34   :  { %207 = vmatpush3.msra.mxu0 %v49_v12 }
  0x35   :  { %208 = vmatprep.subr.mxu0 %v48_v13 }
  0x36   :  { %209 = vmatpush3.msra.mxu0 %v48_v13 }
  0x37   :  { %210 = vmatprep.subr.mxu0 %v47_v14 }
  0x38   :  { %211 = vmatpush3.msra.mxu0 %v47_v14 }
  0x39   :  { %212 = vmatprep.subr.mxu0 %v46_v15 }
  0x3a   :  { %213 = vmatpush3.msra.mxu0 %v46_v15 }
  0x3b   :  { %214 = vmatprep.subr.mxu0 %v45_v16 }
  0x3c   :  { %215 = vmatpush3.msra.mxu0 %v45_v16 }
  0x3d   :  { %217 = vmatmul.mubr.f32.vlgmr.msra.gmra.mxu0 %v44_v17 }
  0xfd   :  { %v218_v19 = vpop.f32.mrf.mxu0 }
  0xfe   :  { %v140_v20 = vadd.f32 %v218_v19, %v165_v18 }
  0xff   :  { %v134_v21 = vpop.f32.mrf.mxu0 }
 0x100   :  { %v144_v22 = vmax.f32 %v140_v20, 0.0  ;;  %v135_v23 = vadd.f32 %v165_v18, %v134_v21 }
 0x102   :  { %146 = vst [vmem:[#allocation7 + $0x8] sm:$0xff] %v144_v22  ;;  %v143_v24 = vmax.f32 %v135_v23, 0.0 }
 0x104   :  { %145 = vst [vmem:[#allocation7] sm:$0xff] %v143_v24 }
 0x105   :  { %275 = shalt.err (!%p272_p0)
}
 0x106   :  { %158 = dma.vmem_to_hbm [thread:$0]  %s153_s25, 256, %s339_s3, [#allocation4], %s291_s15, %s291_s15, %s292_s16  }
 0x107   :  { %288 = dma.done.wait [#allocation4], 256  }
 0x108   :  { %289 = vsyncadd [#allocation4], 4294967040 }
 0x109   :  { %162 = vsyncpa [#allocation3], 1 }
 0x10a   :  { %163 = vsyncpa [#allocation6], 1 }
 0x10b   :  { %164 = vsyncpa [#allocation4], 1 }

</bundles_post_ra>
